<compile_context>
chip_gen: v7x
topology: tpu7x:2x2x1
jax: 0.10.0
libtpu: 0.0.40
codegen_flags: <defaults>
</compile_context>

<pallas_src>
import math
import functools

import jax
import jax.numpy as jnp
from jax.experimental import pallas as pl
from jax.experimental.pallas import tpu as pltpu


def _hash_u32(idx, seed):
    """lowbias32-style mixer: (uint32 counter, uint32 seed) -> mixed uint32 bits."""
    h = idx + seed * jnp.uint32(0x9E3779B9)
    h = h ^ (h >> 16)
    h = h * jnp.uint32(0x7FEB352D)
    h = h ^ (h >> 15)
    h = h * jnp.uint32(0x846CA68B)
    h = h ^ (h >> 16)
    return h


def _posenc_kernel(seed_ref, x_ref, pe_ref, out_ref, *, dropout_p, training, tile_seq):
    # seed_ref: (1,) int32, SMEM (scalar prefetch)
    # x_ref   : (TS, batch, d_model) VMEM block
    # pe_ref  : (TS, 1,     d_model) VMEM block (broadcast over batch)
    y = x_ref[...] + pe_ref[...]  # broadcast add over the batch axis

    if training and dropout_p > 0.0:
        ts, b, d = y.shape  # static block shape
        seed = seed_ref[0].astype(jnp.uint32)
        # Global element counter -> dropout mask is independent of the tiling
        # and distinct across tiles (tile offset folded in via program_id).
        row0 = (pl.program_id(0) * tile_seq).astype(jnp.uint32)
        r = jax.lax.broadcasted_iota(jnp.int32, y.shape, 0).astype(jnp.uint32) + row0
        c = jax.lax.broadcasted_iota(jnp.int32, y.shape, 1).astype(jnp.uint32)
        k = jax.lax.broadcasted_iota(jnp.int32, y.shape, 2).astype(jnp.uint32)
        idx = (r * jnp.uint32(b) + c) * jnp.uint32(d) + k
        bits = _hash_u32(idx, seed)
        # Inverted dropout: keep with prob (1 - p), scale kept values by 1/(1-p).
        threshold = jnp.uint32(min(int(dropout_p * (2.0 ** 32)), 2 ** 32 - 1))
        keep = bits >= threshold
        scale = jnp.asarray(1.0 / (1.0 - dropout_p), y.dtype)
        y = jnp.where(keep, y * scale, jnp.zeros_like(y))

    out_ref[...] = y.astype(out_ref.dtype)


def make_pe_table(d_model, max_len=5000, dtype=jnp.float32):
    """Deterministic sinusoidal PE table, identical to the PyTorch __init__."""
    position = jnp.arange(max_len, dtype=jnp.float32)[:, None]           # (max_len, 1)
    div_term = jnp.exp(
        jnp.arange(0, d_model, 2, dtype=jnp.float32) * (-math.log(10000.0) / d_model)
    )                                                                    # (d_model/2,)
    ang = position * div_term                                            # (max_len, d/2)
    pe = jnp.zeros((max_len, 1, d_model), dtype=jnp.float32)
    pe = pe.at[:, 0, 0::2].set(jnp.sin(ang))
    pe = pe.at[:, 0, 1::2].set(jnp.cos(ang))
    return pe.astype(dtype)


def _pick_tile_seq(seq, batch, d, itemsize, target_bytes=2 * 1024 * 1024):
    """Largest seq-tile whose x block stays under ~target_bytes. With double
    buffering of x and out plus the small PE block, the working set remains
    well inside every generation's scoped VMEM (v5e 16 MiB, v7x 32 MiB)."""
    row_bytes = max(1, batch * d * itemsize)
    ts = max(1, target_bytes // row_bytes)
    ts = min(seq, ts)
    if ts >= 8:
        ts = (ts // 8) * 8  # sublane-friendly
    return int(ts)


def positional_encoding(x, pe, seed, *, dropout_p=0.1, training=True):
    """x: (seq, batch, d_model); pe: (max_len, 1, d_model); seed: python int."""
    seq, batch, d = x.shape
    pe_slice = pe[:seq].astype(x.dtype)  # (seq, 1, d)

    ts = _pick_tile_seq(seq, batch, d, jnp.dtype(x.dtype).itemsize)
    grid = (pl.cdiv(seq, ts),)

    kernel = functools.partial(
        _posenc_kernel, dropout_p=dropout_p, training=training, tile_seq=ts)

    # TODO(synk): at toy sizes (or when a producer/consumer kernel exists) this
    # memory-bound epilogue is best fused into the adjacent op instead.
    return pl.pallas_call(
        kernel,
        out_shape=jax.ShapeDtypeStruct((seq, batch, d), x.dtype),
        grid_spec=pltpu.PrefetchScalarGridSpec(
            num_scalar_prefetch=1,
            grid=grid,
            # Tile only over seq; the trailing (batch, d) dims equal the full
            # array dims, satisfying the (8,128) block constraint for any shape.
            in_specs=[
                pl.BlockSpec((ts, batch, d), lambda s, seed_ref: (s, 0, 0)),
                pl.BlockSpec((ts, 1, d), lambda s, seed_ref: (s, 0, 0)),
            ],
            out_specs=pl.BlockSpec((ts, batch, d), lambda s, seed_ref: (s, 0, 0)),
        ),
        compiler_params=pltpu.CompilerParams(
            # Tiles are independent -> shard across v7x's 2 TensorCores.
            dimension_semantics=("parallel",),
            vmem_limit_bytes=32 * 1024 * 1024,
        ),
    )(jnp.asarray([seed], dtype=jnp.int32), x, pe_slice)


if __name__ == "__main__":
    key = jax.random.PRNGKey(0)
    seq_len, batch, d_model = 8, 2, 32

    x = jax.random.normal(key, (seq_len, batch, d_model), dtype=jnp.float32)
    pe = make_pe_table(d_model, max_len=5000)

    # Training mode: PE add + stochastic inverted dropout (p=0.1) in the kernel.
    out_train = positional_encoding(x, pe, seed=42, dropout_p=0.1, training=True)
    jax.block_until_ready(out_train)
    assert out_train.shape == (seq_len, batch, d_model)
    assert bool(jnp.all(jnp.isfinite(out_train)))

    # Eval mode (dropout is identity): verify against a pure-JAX reference.
    out_eval = positional_encoding(x, pe, seed=0, dropout_p=0.1, training=False)
    jax.block_until_ready(out_eval)
    ref = x + pe[:seq_len]
    assert out_eval.shape == (seq_len, batch, d_model)
    assert jnp.allclose(out_eval, ref, atol=1e-6), "eval-mode mismatch vs reference"

    print("KERNEL_OK")
</pallas_src>

<mosaic_0001>
module attributes {stable_mosaic.version = 11 : i64} {
  func.func @_posenc_kernel(%arg0: i32, %arg1: memref<1xi32, #tpu.memory_space<smem>>, %arg2: memref<8x2x32xf32, #tpu.memory_space<vmem>>, %arg3: memref<8x1x32xf32, #tpu.memory_space<vmem>>, %arg4: memref<8x2x32xf32, #tpu.memory_space<vmem>>) attributes {dimension_semantics = [#tpu.dimension_semantics<parallel>], iteration_bounds = array<i64: 1>, scalar_prefetch = 1 : i64, scratch_operands = 0 : i64, tpu.core_type = #tpu.core_type<tc>, window_params = [{transform_indices = @transform_0, window_bounds = array<i64: 8, 2, 32>}, {transform_indices = @transform_1, window_bounds = array<i64: 8, 1, 32>}, {transform_indices = @transform_2, window_bounds = array<i64: 8, 2, 32>}]} {
    %c0 = arith.constant 0 : index
    %c0_0 = arith.constant 0 : index
    %c0_1 = arith.constant 0 : index
    %0 = vector.load %arg2[%c0, %c0_0, %c0_1] : memref<8x2x32xf32, #tpu.memory_space<vmem>>, vector<8x2x32xf32>
    %c0_2 = arith.constant 0 : index
    %c0_3 = arith.constant 0 : index
    %c0_4 = arith.constant 0 : index
    %1 = vector.load %arg3[%c0_2, %c0_3, %c0_4] : memref<8x1x32xf32, #tpu.memory_space<vmem>>, vector<8x1x32xf32>
    %2 = vector.broadcast %1 : vector<8x1x32xf32> to vector<8x2x32xf32>
    %3 = arith.addf %0, %2 : vector<8x2x32xf32>
    %c0_5 = arith.constant 0 : index
    %4 = memref.load %arg1[%c0_5] : memref<1xi32, #tpu.memory_space<smem>>
    %c8_i32 = arith.constant 8 : i32
    %5 = arith.muli %arg0, %c8_i32 : i32
    %6 = tpu.iota {dimensions = array<i32: 0>} : vector<8x2x32xi32>
    %7 = vector.broadcast %5 : i32 to vector<8x2x32xi32>
    %8 = arith.addi %6, %7 : vector<8x2x32xi32>
    %9 = tpu.iota {dimensions = array<i32: 1>} : vector<8x2x32xi32>
    %10 = tpu.iota {dimensions = array<i32: 2>} : vector<8x2x32xi32>
    %c2_i32 = arith.constant 2 : i32
    %11 = vector.broadcast %c2_i32 : i32 to vector<8x2x32xi32>
    %12 = arith.muli %8, %11 : vector<8x2x32xi32>
    %13 = arith.addi %12, %9 : vector<8x2x32xi32>
    %c32_i32 = arith.constant 32 : i32
    %14 = vector.broadcast %c32_i32 : i32 to vector<8x2x32xi32>
    %15 = arith.muli %13, %14 : vector<8x2x32xi32>
    %16 = arith.addi %15, %10 : vector<8x2x32xi32>
    %c-1640531527_i32 = arith.constant -1640531527 : i32
    %17 = arith.muli %4, %c-1640531527_i32 : i32
    %18 = vector.broadcast %17 : i32 to vector<8x2x32xi32>
    %19 = arith.addi %16, %18 : vector<8x2x32xi32>
    %c16_i32 = arith.constant 16 : i32
    %20 = vector.broadcast %c16_i32 : i32 to vector<8x2x32xi32>
    %21 = arith.shrui %19, %20 : vector<8x2x32xi32>
    %22 = arith.xori %19, %21 : vector<8x2x32xi32>
    %c2146121005_i32 = arith.constant 2146121005 : i32
    %23 = vector.broadcast %c2146121005_i32 : i32 to vector<8x2x32xi32>
    %24 = arith.muli %22, %23 : vector<8x2x32xi32>
    %c15_i32 = arith.constant 15 : i32
    %25 = vector.broadcast %c15_i32 : i32 to vector<8x2x32xi32>
    %26 = arith.shrui %24, %25 : vector<8x2x32xi32>
    %27 = arith.xori %24, %26 : vector<8x2x32xi32>
    %c-2073254261_i32 = arith.constant -2073254261 : i32
    %28 = vector.broadcast %c-2073254261_i32 : i32 to vector<8x2x32xi32>
    %29 = arith.muli %27, %28 : vector<8x2x32xi32>
    %c16_i32_6 = arith.constant 16 : i32
    %30 = vector.broadcast %c16_i32_6 : i32 to vector<8x2x32xi32>
    %31 = arith.shrui %29, %30 : vector<8x2x32xi32>
    %32 = arith.xori %29, %31 : vector<8x2x32xi32>
    %c429496729_i32 = arith.constant 429496729 : i32
    %33 = vector.broadcast %c429496729_i32 : i32 to vector<8x2x32xi32>
    %34 = arith.cmpi uge, %32, %33 : vector<8x2x32xi32>
    %cst = arith.constant 1.11111116 : f32
    %35 = vector.broadcast %cst : f32 to vector<8x2x32xf32>
    %36 = arith.mulf %3, %35 : vector<8x2x32xf32>
    %cst_7 = arith.constant 0.000000e+00 : f32
    %37 = vector.broadcast %cst_7 : f32 to vector<8x2x32xf32>
    %38 = arith.select %34, %36, %37 : vector<8x2x32xi1>, vector<8x2x32xf32>
    %c0_8 = arith.constant 0 : index
    %c0_9 = arith.constant 0 : index
    %c0_10 = arith.constant 0 : index
    %39 = vector.load %arg4[%c0_8, %c0_9, %c0_10] : memref<8x2x32xf32, #tpu.memory_space<vmem>>, vector<8x2x32xf32>
    tpu.vector_store %arg4[%c0_8, %c0_9, %c0_10], %38 {strides = array<i32>} : memref<8x2x32xf32, #tpu.memory_space<vmem>>, vector<8x2x32xf32>,
    return
  }
  func.func @transform_0(%arg0: i32, %arg1: memref<1xi32, #tpu.memory_space<smem>>) -> (i32, i32, i32) {
    %c0_i32 = arith.constant 0 : i32
    %c0_i32_0 = arith.constant 0 : i32
    %c0_i32_1 = arith.constant 0 : i32
    return %arg0, %c0_i32, %c0_i32_0 : i32, i32, i32
  }
  func.func @transform_1(%arg0: i32, %arg1: memref<1xi32, #tpu.memory_space<smem>>) -> (i32, i32, i32) {
    %c0_i32 = arith.constant 0 : i32
    %c0_i32_0 = arith.constant 0 : i32
    %c0_i32_1 = arith.constant 0 : i32
    return %arg0, %c0_i32, %c0_i32_0 : i32, i32, i32
  }
  func.func @transform_2(%arg0: i32, %arg1: memref<1xi32, #tpu.memory_space<smem>>) -> (i32, i32, i32) {
    %c0_i32 = arith.constant 0 : i32
    %c0_i32_0 = arith.constant 0 : i32
    %c0_i32_1 = arith.constant 0 : i32
    return %arg0, %c0_i32, %c0_i32_0 : i32, i32, i32
  }
}

</mosaic_0001>

<bundles_post_ra>
// kernel: tpu_custom_call.1
= control target key start
LH: loop header
LB: loop body
LE: loop exit
PB: predicated region body
PF: predicated region fallthrough
CT: control target
= control target key end

     0   :  { %9 = vsyncpa [#allocation5], 0  ;;  %s472_s0 = inlined_call_operand.<no memory space> [shape: s32[1], index: 0, kind: input, shape index: {}]   ;;  %s473_s1 = inlined_call_operand.hbm [shape: f32[8,2,32], index: 1, kind: input, shape index: {}]   ;;  %s474_s2 = inlined_call_operand.hbm [shape: f32[8,1,32], index: 2, kind: input, shape index: {}]   ;;  %s475_s3 = inlined_call_operand.hbm [shape: f32[8,2,32], index: 3, kind: output, shape index: {}]  }
   0x1   :  { %10 = vsyncpa [#allocation8], 0 }
   0x2   :  { %11 = vsyncpa [#allocation6], 0  ;;  %s372_s12 = smov [#allocation4]   ;;  %s300_s16 = scalar_lea.hbm %s473_s1, 256 }
   0x3   :  { %s17_s13 = sshll.u32 %s372_s12, 4  ;;  %p301_p0 = scmp.ne.s32.totalorder %s473_s1, %s300_s16  ;;  %s18_s13 = int_to_ptr.vmem [resolvable:$true] %s17_s13 }
   0x4   :  { %p304_p1 = scmp.lt.u32.totalorder %s300_s16, %s473_s1 }
   0x6   :  { %p306_p2 = pnand %p304_p1, %p301_p0 }
   0x8   :  { %309 = shalt.err (!%p306_p2)
}
   0x9   :  { %s310_s21 = scalar_lea.vmem %s18_s13, 256  ;;  %p315_p4 = scmp.lt.s32.totalorder %s18_s13, %s18_s13 }
   0xa   :  { %p311_p3 = scmp.ne.s32.totalorder %s18_s13, %s310_s21  ;;  %p316_p5 = scmp.lt.s32.totalorder %s310_s21, %s310_s21 }
   0xc   :  { %p317_p6 = por %p316_p5, %p315_p4 }
   0xe   :  { %p318_p7 = pnand %p317_p6, %p311_p3 }
  0x10   :  { %321 = shalt.err (!%p318_p7)
}
  0x11   :  { %s373_s22 = smov 32   ;;  %s374_s23 = smov 2  }
  0x12   :  { %23 = dma.hbm_to_vmem [thread:$0]  %s473_s1, 256, %s18_s13, [#allocation5], %s373_s22, %s373_s22, %s374_s23  }
  0x13   :  { %s375_s26 = smov [#allocation7]   ;;  %s322_s30 = scalar_lea.hbm %s474_s2, 128 }
  0x14   :  { %s29_s27 = sshll.u32 %s375_s26, 4  ;;  %p323_p8 = scmp.ne.s32.totalorder %s474_s2, %s322_s30  ;;  %s30_s27 = int_to_ptr.vmem [resolvable:$true] %s29_s27 }
  0x15   :  { %p326_p9 = scmp.lt.u32.totalorder %s322_s30, %s474_s2 }
  0x17   :  { %p328_p10 = pnand %p326_p9, %p323_p8 }
  0x19   :  { %331 = shalt.err (!%p328_p10)
}
  0x1a   :  { %s332_s8 = scalar_lea.vmem %s30_s27, 128  ;;  %p337_p12 = scmp.lt.s32.totalorder %s30_s27, %s30_s27 }
  0x1b   :  { %p333_p11 = scmp.ne.s32.totalorder %s30_s27, %s332_s8  ;;  %p338_p13 = scmp.lt.s32.totalorder %s332_s8, %s332_s8 }
  0x1d   :  { %p339_p0 = por %p338_p13, %p337_p12 }
  0x1f   :  { %p340_p1 = pnand %p339_p0, %p333_p11 }
  0x21   :  { %343 = shalt.err (!%p340_p1)
}
  0x22   :  { %s376_s1 = smov 16   ;;  %s377_s9 = smov 1  }
  0x23   :  { %35 = dma.hbm_to_vmem [thread:$0]  %s474_s2, 128, %s30_s27, [#allocation8], %s376_s1, %s376_s1, %s377_s9  }
  0x24   :  { %366 = dma.done.wait [#allocation5], 256  }
  0x25   :  { %367 = vsyncadd [#allocation5], 4294967040 }
  0x26   :  { %368 = dma.done.wait [#allocation8], 128  }
  0x27   :  { %369 = vsyncadd [#allocation8], 4294967168  ;;  %v124_v0 = vlaneseq  ;;  %s160_s14 = smul.u32 2654435769, %s472_s0  ;;  %v42_v12 = vld [vmem:[#allocation4] sm:$0x3] }
  0x28   :  { %v285_v13 = vld [vmem:[#allocation7] ss:$0 sm:$0xff]  ;;  %v43_v15 = vld [vmem:[#allocation4 + $0x2] sm:$0x3]  ;;  %v286_v16 = vld [vmem:[#allocation7 + $0x1] ss:$0 sm:$0xff] }
  0x29   :  { %v125_v1 = vshrl.u32 %v124_v0, 7  ;;  %v429_v2 = vand.u32 127, %v124_v0  ;;  %v431_v6 = vstv %s160_s14  ;;  %v106_v21 = vadd.f32 %v285_v13, %v42_v12  ;;  %v44_v24 = vld [vmem:[#allocation4 + $0x4] sm:$0x3]  ;;  %v287_v25 = vld [vmem:[#allocation7 + $0x2] ss:$0 sm:$0xff] }
  0x2a   :  { %v107_v27 = vadd.f32 %v286_v16, %v43_v15  ;;  %v108_v34 = vadd.f32 %v287_v25, %v44_v24  ;;  %v45_v35 = vld [vmem:[#allocation4 + $0x6] sm:$0x3]  ;;  %v288_v36 = vld [vmem:[#allocation7 + $0x3] ss:$0 sm:$0xff]  ;;  %vm258_vm0 = vcmask 254976   ;;  %s378_s0 = smov [#allocation9]  }
  0x2b   :  { %v144_v3 = vmul.u32 32, %v125_v1  ;;  %v137_v4 = vadd.s32 2, %v125_v1  ;;  %v138_v5 = vadd.s32 4, %v125_v1  ;;  %v139_v7 = vadd.s32 6, %v125_v1  ;;  %v46_v61 = vld [vmem:[#allocation4 + $0x8] sm:$0x3] }
  0x2c   :  { %v140_v8 = vadd.s32 8, %v125_v1  ;;  %v141_v29 = vadd.s32 10, %v125_v1  ;;  %v142_v33 = vadd.s32 12, %v125_v1  ;;  %v143_v39 = vadd.s32 14, %v125_v1  ;;  %v289_v62 = vld [vmem:[#allocation7 + $0x4] ss:$0 sm:$0xff] }
  0x2d   :  { %v152_v9 = vadd.s32 %v144_v3, %v429_v2  ;;  %v145_v10 = vmul.u32 32, %v137_v4  ;;  %v146_v11 = vmul.u32 32, %v138_v5  ;;  %v242_v41 = vmul.f32 1.1111112, %v106_v21  ;;  %s272_s2 = sshll.u32 %s378_s0, 4  ;;  %s273_s2 = int_to_ptr.vmem [resolvable:$true] %s272_s2 }
  0x2e   :  { %v147_v19 = vmul.u32 32, %v139_v7  ;;  %v148_v20 = vmul.u32 32, %v140_v8  ;;  %v243_v44 = vmul.f32 1.1111112, %v107_v27  ;;  %v109_v51 = vadd.f32 %v288_v36, %v45_v35  ;;  %s344_s15 = scalar_lea.vmem %s273_s2, 256  ;;  %p349_p3 = scmp.lt.s32.totalorder %s273_s2, %s273_s2 }
  0x2f   :  { %v162_v14 = vadd.s32 %v431_v6, %v152_v9  ;;  %v153_v17 = vadd.s32 %v145_v10, %v429_v2  ;;  %v154_v18 = vadd.s32 %v146_v11, %v429_v2  ;;  %v149_v47 = vmul.u32 32, %v141_v29  ;;  %p345_p2 = scmp.ne.s32.totalorder %s273_s2, %s344_s15  ;;  %p350_p4 = scmp.lt.s32.totalorder %s344_s15, %s344_s15 }
  0x30   :  { %v155_v28 = vadd.s32 %v147_v19, %v429_v2  ;;  %v156_v38 = vadd.s32 %v148_v20, %v429_v2  ;;  %v150_v55 = vmul.u32 32, %v142_v33  ;;  %v244_v59 = vmul.f32 1.1111112, %v108_v34 }
  0x31   :  { %v170_v22 = vshrl.u32 %v162_v14, 16  ;;  %v163_v23 = vadd.s32 %v431_v6, %v153_v17  ;;  %v164_v26 = vadd.s32 %v431_v6, %v154_v18  ;;  %v157_v54 = vadd.s32 %v149_v47, %v429_v2  ;;  %p351_p5 = por %p350_p4, %p349_p3 }
  0x32   :  { %v165_v37 = vadd.s32 %v431_v6, %v155_v28  ;;  %v166_v46 = vadd.s32 %v431_v6, %v156_v38  ;;  %v158_v1 = vadd.s32 %v150_v55, %v429_v2  ;;  %v245_v7 = vmul.f32 1.1111112, %v109_v51 }
  0x33   :  { %v178_v30 = vxor.u32 %v170_v22, %v162_v14  ;;  %v171_v31 = vshrl.u32 %v163_v23, 16  ;;  %v172_v32 = vshrl.u32 %v164_v26, 16  ;;  %v167_v0 = vadd.s32 %v431_v6, %v157_v54  ;;  %p352_p6 = pnand %p351_p5, %p345_p2 }
  0x34   :  { %v173_v45 = vshrl.u32 %v165_v37, 16  ;;  %v174_v53 = vshrl.u32 %v166_v46, 16  ;;  %v168_v11 = vadd.s32 %v431_v6, %v158_v1  ;;  %v110_v15 = vadd.f32 %v289_v62, %v46_v61  ;;  %v49_v61 = vld [vmem:[#allocation4 + $0xe] sm:$0x3]  ;;  %v292_v62 = vld [vmem:[#allocation7 + $0x7] ss:$0 sm:$0xff] }
  0x35   :  { %v186_v40 = vmul.u32 2146121005, %v178_v30  ;;  %v179_v42 = vxor.u32 %v171_v31, %v163_v23  ;;  %v180_v43 = vxor.u32 %v172_v32, %v164_v26  ;;  %v175_v10 = vshrl.u32 %v167_v0, 16  ;;  %v47_v30 = vld [vmem:[#allocation4 + $0xa] sm:$0x3] }
  0x36   :  { %v181_v52 = vxor.u32 %v173_v45, %v165_v37  ;;  %v182_v63 = vxor.u32 %v174_v53, %v166_v46  ;;  %v176_v19 = vshrl.u32 %v168_v11, 16  ;;  %v151_v23 = vmul.u32 32, %v143_v39  ;;  %v290_v31 = vld [vmem:[#allocation7 + $0x5] ss:$0 sm:$0xff]  ;;  %v48_v45 = vld [vmem:[#allocation4 + $0xc] sm:$0x3] }
  0x37   :  { %v194_v48 = vshrl.u32 %v186_v40, 15  ;;  %v187_v49 = vmul.u32 2146121005, %v179_v42  ;;  %v188_v50 = vmul.u32 2146121005, %v180_v43  ;;  %v183_v18 = vxor.u32 %v175_v10, %v167_v0 }
  0x38   :  { %v189_v60 = vmul.u32 2146121005, %v181_v52  ;;  %v190_v9 = vmul.u32 2146121005, %v182_v63  ;;  %v184_v27 = vxor.u32 %v176_v19, %v168_v11  ;;  %v159_v32 = vadd.s32 %v151_v23, %v429_v2  ;;  %v291_v46 = vld [vmem:[#allocation7 + $0x6] ss:$0 sm:$0xff] }
  0x39   :  { %v202_v56 = vxor.u32 %v194_v48, %v186_v40  ;;  %v195_v57 = vshrl.u32 %v187_v49, 15  ;;  %v196_v58 = vshrl.u32 %v188_v50, 15  ;;  %v191_v26 = vmul.u32 2146121005, %v183_v18 }
  0x3a   :  { %v197_v8 = vshrl.u32 %v189_v60, 15  ;;  %v198_v17 = vshrl.u32 %v190_v9, 15  ;;  %v192_v37 = vmul.u32 2146121005, %v184_v27  ;;  %v169_v38 = vadd.s32 %v431_v6, %v159_v32 }
  0x3b   :  { %v210_v3 = vmul.u32 2221713035, %v202_v56  ;;  %v203_v4 = vxor.u32 %v195_v57, %v187_v49  ;;  %v204_v5 = vxor.u32 %v196_v58, %v188_v50  ;;  %v199_v36 = vshrl.u32 %v191_v26, 15 }
  0x3c   :  { %v205_v16 = vxor.u32 %v197_v8, %v189_v60  ;;  %v206_v25 = vxor.u32 %v198_v17, %v190_v9  ;;  %v246_v2 = vmul.f32 1.1111112, %v110_v15  ;;  %v200_v47 = vshrl.u32 %v192_v37, 15 }
  0x3d   :  { %v218_v12 = vshrl.u32 %v210_v3, 16  ;;  %v211_v13 = vmul.u32 2221713035, %v203_v4  ;;  %v212_v14 = vmul.u32 2221713035, %v204_v5  ;;  %v177_v48 = vshrl.u32 %v169_v38, 16 }
  0x3e   :  { %v213_v24 = vmul.u32 2221713035, %v205_v16  ;;  %v214_v35 = vmul.u32 2221713035, %v206_v25  ;;  %v111_v50 = vadd.f32 %v290_v31, %v47_v30  ;;  %v208_v6 = vxor.u32 %v200_v47, %v192_v37 }
  0x3f   :  { %v226_v20 = vxor.u32 %v218_v12, %v210_v3  ;;  %v219_v21 = vshrl.u32 %v211_v13, 16  ;;  %v220_v22 = vshrl.u32 %v212_v14, 16  ;;  %v112_v53 = vadd.f32 %v291_v46, %v48_v45 }
  0x40   :  { %v221_v34 = vshrl.u32 %v213_v24, 16  ;;  %v222_v43 = vshrl.u32 %v214_v35, 16  ;;  %v216_v56 = vmul.u32 2221713035, %v208_v6  ;;  %v247_v58 = vmul.f32 1.1111112, %v111_v50 }
  0x41   :  { %vm234_vm1 = vcmp.ge.u32.totalorder %v226_v20, 429496729  ;;  %v227_v28 = vxor.u32 %v219_v21, %v211_v13  ;;  %v228_v29 = vxor.u32 %v220_v22, %v212_v14  ;;  %v248_v0 = vmul.f32 1.1111112, %v112_v53 }
  0x42   :  { %v250_v33 = vsel %vm234_vm1, %v242_v41, 0.0  ;;  %v229_v42 = vxor.u32 %v221_v34, %v213_v24  ;;  %v207_v41 = vxor.u32 %v199_v36, %v191_v26  ;;  %v230_v49 = vxor.u32 %v222_v43, %v214_v35 }
  0x43   :  { %259 = vst.msk [vmem:[#allocation9] sm:$0x3] %vm258_vm0, %v250_v33  ;;  %vm235_vm2 = vcmp.ge.u32.totalorder %v227_v28, 429496729  ;;  %vm236_vm3 = vcmp.ge.u32.totalorder %v228_v29, 429496729  ;;  %v113_v5 = vadd.f32 %v292_v62, %v49_v61 }
  0x44   :  { %v251_v39 = vsel %vm235_vm2, %v243_v44, 0.0  ;;  %v252_v40 = vsel %vm236_vm3, %v244_v59, 0.0  ;;  %vm237_vm4 = vcmp.ge.u32.totalorder %v229_v42, 429496729  ;;  %v215_v52 = vmul.u32 2221713035, %v207_v41 }
  0x45   :  { %260 = vst.msk [vmem:[#allocation9 + $0x2] sm:$0x3] %vm258_vm0, %v251_v39  ;;  %261 = vst.msk [vmem:[#allocation9 + $0x4] sm:$0x3] %vm258_vm0, %v252_v40  ;;  %v253_v51 = vsel %vm237_vm4, %v245_v7, 0.0  ;;  %v185_v44 = vxor.u32 %v177_v48, %v169_v38  ;;  %v224_v60 = vshrl.u32 %v216_v56, 16 }
  0x46   :  { %262 = vst.msk [vmem:[#allocation9 + $0x6] sm:$0x3] %vm258_vm0, %v253_v51  ;;  %vm238_vm5 = vcmp.ge.u32.totalorder %v230_v49, 429496729  ;;  %v223_v55 = vshrl.u32 %v215_v52, 16 }
  0x47   :  { %v254_v54 = vsel %vm238_vm5, %v246_v2, 0.0  ;;  %v193_v57 = vmul.u32 2146121005, %v185_v44  ;;  %v232_v1 = vxor.u32 %v224_v60, %v216_v56  ;;  %v249_v10 = vmul.f32 1.1111112, %v113_v5 }
  0x48   :  { %263 = vst.msk [vmem:[#allocation9 + $0x8] sm:$0x3] %vm258_vm0, %v254_v54  ;;  %v231_v59 = vxor.u32 %v223_v55, %v215_v52 }
  0x49   :  { %v201_v63 = vshrl.u32 %v193_v57, 15  ;;  %vm240_vm7 = vcmp.ge.u32.totalorder %v232_v1, 429496729 }
  0x4a   :  { %vm239_vm6 = vcmp.ge.u32.totalorder %v231_v59, 429496729  ;;  %v256_v8 = vsel %vm240_vm7, %v248_v0, 0.0 }
  0x4b   :  { %v209_v3 = vxor.u32 %v201_v63, %v193_v57  ;;  %v255_v4 = vsel %vm239_vm6, %v247_v58, 0.0  ;;  %265 = vst.msk [vmem:[#allocation9 + $0xc] sm:$0x3] %vm258_vm0, %v256_v8 }
  0x4c   :  { %264 = vst.msk [vmem:[#allocation9 + $0xa] sm:$0x3] %vm258_vm0, %v255_v4 }
  0x4d   :  { %v217_v7 = vmul.u32 2221713035, %v209_v3 }
  0x4f   :  { %v225_v9 = vshrl.u32 %v217_v7, 16 }
  0x51   :  { %v233_v11 = vxor.u32 %v225_v9, %v217_v7 }
  0x53   :  { %vm241_vm8 = vcmp.ge.u32.totalorder %v233_v11, 429496729 }
  0x54   :  { %v257_v12 = vsel %vm241_vm8, %v249_v10, 0.0 }
  0x55   :  { %266 = vst.msk [vmem:[#allocation9 + $0xe] sm:$0x3] %vm258_vm0, %v257_v12 }
  0x56   :  { %355 = shalt.err (!%p352_p6)
}
  0x57   :  { %s356_s18 = scalar_lea.hbm %s475_s3, 256 }
  0x58   :  { %p357_p7 = scmp.ne.s32.totalorder %s475_s3, %s356_s18  ;;  %p360_p8 = scmp.lt.u32.totalorder %s356_s18, %s475_s3 }
  0x5a   :  { %p362_p9 = pnand %p360_p8, %p357_p7 }
  0x5c   :  { %365 = shalt.err (!%p362_p9)
}
  0x5d   :  { %278 = dma.vmem_to_hbm [thread:$0]  %s273_s2, 256, %s475_s3, [#allocation6], %s373_s22, %s373_s22, %s374_s23  }
  0x5e   :  { %370 = dma.done.wait [#allocation6], 256  }
  0x5f   :  { %371 = vsyncadd [#allocation6], 4294967040 }
  0x60   :  { %282 = vsyncpa [#allocation5], 1 }
  0x61   :  { %283 = vsyncpa [#allocation8], 1 }
  0x62   :  { %284 = vsyncpa [#allocation6], 1 }

</bundles_post_ra>
